<compile_context>
chip_gen: v5e
topology: v5e:2x2
jax: 0.10.0
libtpu: 0.0.40
codegen_flags: <defaults>
</compile_context>

<pallas_src>
import functools

import jax
import jax.numpy as jnp
import numpy as np
from jax import lax
from jax.experimental import pallas as pl
from jax.experimental.pallas import tpu as pltpu


def _round_up(x: int, m: int) -> int:
    return (x + m - 1) // m * m


# ---------------------------------------------------------------------------
# Pallas kernel: fused farthest-point sampling + gather, one batch per grid step
# ---------------------------------------------------------------------------
def _fps_gather_kernel(starts_ref, pts_ref, out_ref, min_ref, *,
                       n_valid, n_pad, k_out, k_pad):
    # starts_ref: (B,) int32 in SMEM (scalar prefetch) -- random start indices
    # pts_ref:    (C, N_pad) channels-first point block (batch dim squeezed)
    # out_ref:    (C, K_pad) gathered output block
    # min_ref:    (1, N_pad) f32 running min squared distance (VMEM scratch)
    b = pl.program_id(0)
    start = starts_ref[b]                                    # scalar int32

    pts = pts_ref[...]                                       # (C, N_pad)
    ptsf = pts.astype(jnp.float32)                           # hoisted cast
    xyz = ptsf[:3, :]                                        # (3, N_pad)

    lane_ids = lax.broadcasted_iota(jnp.int32, (1, n_pad), 1)
    k_ids = lax.broadcasted_iota(jnp.int32, (1, k_pad), 1)

    def select(mask):
        # Exact one-hot "gather" of the selected point via cross-lane reduction
        # (only a single lane is non-zero, so the sum is exact).
        sel = jnp.sum(jnp.where(mask, ptsf, 0.0), axis=1, keepdims=True)  # (C,1)
        diff = xyz - sel[:3, :]                                           # (3,N_pad)
        d = jnp.sum(diff * diff, axis=0, keepdims=True)                   # (1,N_pad)
        return sel, d

    def mask_invalid(d):
        if n_valid < n_pad:
            # padded lanes can never win the argmax (valid distances are >= 0)
            return jnp.where(lane_ids < n_valid, d, -1.0)
        return d

    # -- iteration 0: random start point -------------------------------------
    sel0, d0 = select(lane_ids == start)
    out_ref[...] = jnp.where(k_ids == 0,
                             sel0.astype(out_ref.dtype),
                             jnp.zeros(out_ref.shape, out_ref.dtype))
    min_ref[...] = mask_invalid(d0)

    # -- iterations 1 .. K-1 ---------------------------------------------------
    def body(k, carry):
        md = min_ref[...]
        # first-index argmax via max-reduce + min(lane index where equal);
        # uses only plain VPU compares + XLU reductions.
        maxv = jnp.max(md, axis=1, keepdims=True)                         # (1,1)
        idx = jnp.min(jnp.where(md == maxv, lane_ids, n_pad),
                      axis=1, keepdims=True)                              # (1,1)
        sel, d = select(lane_ids == idx)
        out_ref[...] = jnp.where(k_ids == k, sel.astype(out_ref.dtype),
                                 out_ref[...])
        min_ref[...] = jnp.minimum(md, mask_invalid(d))
        return carry

    lax.fori_loop(1, k_out, body, 0)


# ---------------------------------------------------------------------------
# Wrapper: layout plumbing + pallas_call
# ---------------------------------------------------------------------------
def fps_subsample_pallas(points: jax.Array, start_idx: jax.Array,
                         num_points: int) -> jax.Array:
    """Fused FPS + gather. points: (B, N, C); start_idx: (B,) int32 -> (B, K, C)."""
    B, N, C = points.shape
    n_pad = _round_up(N, 128)
    k_pad = _round_up(num_points, 128)

    # channels-first, lane-dense layout; zero-pad N up to a lane multiple
    pts_cf = jnp.transpose(points, (0, 2, 1))                # (B, C, N)
    if n_pad != N:
        pts_cf = jnp.pad(pts_cf, ((0, 0), (0, 0), (0, n_pad - N)))

    kernel = functools.partial(_fps_gather_kernel, n_valid=N, n_pad=n_pad,
                               k_out=num_points, k_pad=k_pad)

    itemsize = jnp.dtype(points.dtype).itemsize
    cost = pl.CostEstimate(
        flops=9 * B * num_points * n_pad,
        transcendentals=0,
        bytes_accessed=B * (C * n_pad + C * k_pad) * itemsize + B * 4,
    )

    # TODO(synk): for very large N the whole (C, N_pad) block stays resident in
    # VMEM per batch; a two-level (tiled) max-reduce would be needed to bound it.
    out_cf = pl.pallas_call(
        kernel,
        out_shape=jax.ShapeDtypeStruct((B, C, k_pad), points.dtype),
        grid_spec=pltpu.PrefetchScalarGridSpec(
            num_scalar_prefetch=1,
            grid=(B,),
            in_specs=[
                pl.BlockSpec((pl.Squeezed(), C, n_pad),
                             lambda b, starts: (b, 0, 0)),
            ],
            out_specs=pl.BlockSpec((pl.Squeezed(), C, k_pad),
                                   lambda b, starts: (b, 0, 0)),
            scratch_shapes=[pltpu.VMEM((1, n_pad), jnp.float32)],
        ),
        compiler_params=pltpu.CompilerParams(
            dimension_semantics=("parallel",),
        ),
        cost_estimate=cost,
    )(start_idx.astype(jnp.int32), pts_cf)

    # back to (B, K, C), dropping the K lane padding
    return jnp.transpose(out_cf[:, :, :num_points], (0, 2, 1))


# ---------------------------------------------------------------------------
# Module-equivalent forward
# ---------------------------------------------------------------------------
def pointcloud_subsampling(points: jax.Array, key, num_points: int,
                           strategy: str = "fps") -> jax.Array:
    """JAX/Pallas equivalent of PointcloudSubsampling.forward."""
    B, N, C = points.shape
    if N < num_points:
        raise RuntimeError(f"Too few points in pointcloud: {N} vs {num_points}")
    if N == num_points:
        return points

    if strategy == "fps":
        starts = jax.random.randint(key, (B,), 0, N, dtype=jnp.int32)
        return fps_subsample_pallas(points, starts, num_points)

    if strategy == "random":
        # TODO(synk): torch.randperm shuffle has no Pallas equivalent; done in
        # plain JAX (the gather it feeds is handled fine by XLA).
        perm = jax.random.permutation(key, N)[:num_points]
        return points[:, perm, :]

    if strategy == "resample":
        if N <= num_points:
            raise RuntimeError("Not enough points")
        samples_for = {1024: 1200, 2048: 2400, 4096: 4800, 8192: 8192}
        if num_points not in samples_for:
            raise NotImplementedError()
        num_samples = min(samples_for[num_points], N)
        k_fps, k_perm = jax.random.split(key)
        starts = jax.random.randint(k_fps, (B,), 0, N, dtype=jnp.int32)
        sampled = fps_subsample_pallas(points, starts, num_samples)
        perm = jax.random.permutation(k_perm, num_samples)[:num_points]
        return sampled[:, perm, :]

    raise RuntimeError(f"No such subsampling strategy {strategy}")


# ---------------------------------------------------------------------------
# Pure-numpy reference (matches pytorch3d sample_farthest_points + gather)
# ---------------------------------------------------------------------------
def _fps_gather_reference(points: np.ndarray, starts: np.ndarray,
                          num_points: int) -> np.ndarray:
    B, N, C = points.shape
    out = np.zeros((B, num_points, C), dtype=points.dtype)
    for b in range(B):
        xyz = points[b, :, :3].astype(np.float32)
        sel = int(starts[b])
        out[b, 0] = points[b, sel]
        diff = xyz - xyz[sel]
        min_d = np.sum(diff * diff, axis=-1)
        for k in range(1, num_points):
            sel = int(np.argmax(min_d))
            out[b, k] = points[b, sel]
            diff = xyz - xyz[sel]
            min_d = np.minimum(min_d, np.sum(diff * diff, axis=-1))
    return out


# ---------------------------------------------------------------------------
# Demo / correctness check
# ---------------------------------------------------------------------------
if __name__ == "__main__":
    key = jax.random.PRNGKey(0)
    k_pts, k_start, k_fwd = jax.random.split(key, 3)

    B, N, C = 2, 200, 4          # xyz + 1 extra feature channel, N not lane-aligned
    num_points = 64
    points = jax.random.normal(k_pts, (B, N, C), dtype=jnp.float32)

    # deterministic start indices so the kernel can be checked against numpy
    starts = jax.random.randint(k_start, (B,), 0, N, dtype=jnp.int32)

    out = jax.block_until_ready(fps_subsample_pallas(points, starts, num_points))
    assert out.shape == (B, num_points, C) and out.dtype == points.dtype

    ref = _fps_gather_reference(np.asarray(points), np.asarray(starts), num_points)
    assert np.allclose(np.asarray(out), ref, atol=1e-5, rtol=1e-5)

    # full module-equivalent forward (draws its own random start points)
    out2 = jax.block_until_ready(
        pointcloud_subsampling(points, k_fwd, num_points, strategy="fps"))
    assert out2.shape == (B, num_points, C)

    print("KERNEL_OK")
</pallas_src>

<mosaic_0001>
module attributes {stable_mosaic.version = 11 : i64} {
  func.func @_fps_gather_kernel(%arg0: i32, %arg1: memref<2xi32, #tpu.memory_space<smem>>, %arg2: memref<1x4x256xf32, #tpu.memory_space<vmem>>, %arg3: memref<1x4x128xf32, #tpu.memory_space<vmem>>, %arg4: memref<1x256xf32, #tpu.memory_space<vmem>>) attributes {dimension_semantics = [#tpu.dimension_semantics<parallel>], iteration_bounds = array<i64: 2>, scalar_prefetch = 1 : i64, scratch_operands = 1 : i64, tpu.core_type = #tpu.core_type<tc>, window_params = [{transform_indices = @transform_0, window_bounds = array<i64: 1, 4, 256>}, {transform_indices = @transform_1, window_bounds = array<i64: 1, 4, 128>}]} {
    %0 = arith.index_cast %arg0 : i32 to index
    %1 = memref.load %arg1[%0] : memref<2xi32, #tpu.memory_space<smem>>
    %c0 = arith.constant 0 : index
    %c0_0 = arith.constant 0 : index
    %c0_1 = arith.constant 0 : index
    %2 = vector.load %arg2[%c0, %c0_0, %c0_1] : memref<1x4x256xf32, #tpu.memory_space<vmem>>, vector<1x4x256xf32>
    %3 = vector.shape_cast %2 : vector<1x4x256xf32> to vector<4x256xf32>
    %4 = vector.extract_strided_slice %3 {offsets = [0, 0], sizes = [3, 256], strides = [1, 1]} : vector<4x256xf32> to vector<3x256xf32>
    %5 = tpu.iota {dimensions = array<i32: 1>} : vector<1x256xi32>
    %6 = tpu.iota {dimensions = array<i32: 1>} : vector<1x128xi32>
    %7 = vector.broadcast %1 : i32 to vector<1x256xi32>
    %8 = arith.cmpi eq, %5, %7 : vector<1x256xi32>
    %cst = arith.constant 0.000000e+00 : f32
    %9 = vector.shape_cast %8 : vector<1x256xi1> to vector<1x256xi1>
    %10 = vector.broadcast %9 : vector<1x256xi1> to vector<4x256xi1>
    %11 = vector.broadcast %cst : f32 to vector<4x256xf32>
    %12 = arith.select %10, %3, %11 : vector<4x256xi1>, vector<4x256xf32>
    %cst_2 = arith.constant dense<0.000000e+00> : vector<4xf32>
    %13 = vector.multi_reduction <add>, %12, %cst_2 [1] : vector<4x256xf32> to vector<4xf32>
    %14 = vector.shape_cast %13 : vector<4xf32> to vector<4x1xf32>
    %15 = vector.extract_strided_slice %14 {offsets = [0, 0], sizes = [3, 1], strides = [1, 1]} : vector<4x1xf32> to vector<3x1xf32>
    %16 = vector.broadcast %15 : vector<3x1xf32> to vector<3x256xf32>
    %17 = arith.subf %4, %16 : vector<3x256xf32>
    %18 = arith.mulf %17, %17 : vector<3x256xf32>
    %cst_3 = arith.constant dense<0.000000e+00> : vector<256xf32>
    %19 = vector.multi_reduction <add>, %18, %cst_3 [0] : vector<3x256xf32> to vector<256xf32>
    %20 = vector.shape_cast %19 : vector<256xf32> to vector<1x256xf32>
    %c0_i32 = arith.constant 0 : i32
    %21 = vector.broadcast %c0_i32 : i32 to vector<1x128xi32>
    %22 = arith.cmpi eq, %6, %21 : vector<1x128xi32>
    %cst_4 = arith.constant 0.000000e+00 : f32
    %23 = vector.broadcast %cst_4 : f32 to vector<4x128xf32>
    %24 = vector.shape_cast %22 : vector<1x128xi1> to vector<1x128xi1>
    %25 = vector.broadcast %24 : vector<1x128xi1> to vector<4x128xi1>
    %26 = vector.shape_cast %14 : vector<4x1xf32> to vector<4x1xf32>
    %27 = vector.broadcast %26 : vector<4x1xf32> to vector<4x128xf32>
    %28 = arith.select %25, %27, %23 : vector<4x128xi1>, vector<4x128xf32>
    %c0_5 = arith.constant 0 : index
    %c0_6 = arith.constant 0 : index
    %c0_7 = arith.constant 0 : index
    %29 = vector.load %arg3[%c0_5, %c0_6, %c0_7] : memref<1x4x128xf32, #tpu.memory_space<vmem>>, vector<1x4x128xf32>
    %30 = vector.shape_cast %29 : vector<1x4x128xf32> to vector<4x128xf32>
    %31 = vector.shape_cast %28 : vector<4x128xf32> to vector<1x4x128xf32>
    tpu.vector_store %arg3[%c0_5, %c0_6, %c0_7], %31 {strides = array<i32>} : memref<1x4x128xf32, #tpu.memory_space<vmem>>, vector<1x4x128xf32>,
    %c200_i32 = arith.constant 200 : i32
    %32 = vector.broadcast %c200_i32 : i32 to vector<1x256xi32>
    %33 = arith.cmpi slt, %5, %32 : vector<1x256xi32>
    %cst_8 = arith.constant -1.000000e+00 : f32
    %34 = vector.broadcast %cst_8 : f32 to vector<1x256xf32>
    %35 = arith.select %33, %20, %34 : vector<1x256xi1>, vector<1x256xf32>
    %c0_9 = arith.constant 0 : index
    %c0_10 = arith.constant 0 : index
    %36 = vector.load %arg4[%c0_9, %c0_10] : memref<1x256xf32, #tpu.memory_space<vmem>>, vector<1x256xf32>
    tpu.vector_store %arg4[%c0_9, %c0_10], %35 {strides = array<i32>} : memref<1x256xf32, #tpu.memory_space<vmem>>, vector<1x256xf32>,
    %c1_i32 = arith.constant 1 : i32
    %c63_i32 = arith.constant 63 : i32
    %37 = arith.addi %c1_i32, %c63_i32 : i32
    %c1_i32_11 = arith.constant 1 : i32
    scf.for %arg5 = %c1_i32 to %37 step %c1_i32_11  : i32 {
      %c0_13 = arith.constant 0 : index
      %c0_14 = arith.constant 0 : index
      %38 = vector.load %arg4[%c0_13, %c0_14] : memref<1x256xf32, #tpu.memory_space<vmem>>, vector<1x256xf32>
      %cst_15 = arith.constant dense<0xFF800000> : vector<1xf32>
      %39 = vector.multi_reduction <maximumf>, %38, %cst_15 [1] : vector<1x256xf32> to vector<1xf32>
      %40 = vector.shape_cast %39 : vector<1xf32> to vector<1x1xf32>
      %41 = vector.broadcast %40 : vector<1x1xf32> to vector<1x256xf32>
      %42 = arith.cmpf oeq, %38, %41 : vector<1x256xf32>
      %c256_i32 = arith.constant 256 : i32
      %43 = vector.broadcast %c256_i32 : i32 to vector<1x256xi32>
      %44 = arith.select %42, %5, %43 : vector<1x256xi1>, vector<1x256xi32>
      %cst_16 = arith.constant dense<2147483647> : vector<1xi32>
      %45 = vector.multi_reduction <minsi>, %44, %cst_16 [1] : vector<1x256xi32> to vector<1xi32>
      %46 = vector.shape_cast %45 : vector<1xi32> to vector<1x1xi32>
      %47 = vector.broadcast %46 : vector<1x1xi32> to vector<1x256xi32>
      %48 = arith.cmpi eq, %5, %47 : vector<1x256xi32>
      %cst_17 = arith.constant 0.000000e+00 : f32
      %49 = vector.shape_cast %48 : vector<1x256xi1> to vector<1x256xi1>
      %50 = vector.broadcast %49 : vector<1x256xi1> to vector<4x256xi1>
      %51 = vector.broadcast %cst_17 : f32 to vector<4x256xf32>
      %52 = arith.select %50, %3, %51 : vector<4x256xi1>, vector<4x256xf32>
      %cst_18 = arith.constant dense<0.000000e+00> : vector<4xf32>
      %53 = vector.multi_reduction <add>, %52, %cst_18 [1] : vector<4x256xf32> to vector<4xf32>
      %54 = vector.shape_cast %53 : vector<4xf32> to vector<4x1xf32>
      %55 = vector.extract_strided_slice %54 {offsets = [0, 0], sizes = [3, 1], strides = [1, 1]} : vector<4x1xf32> to vector<3x1xf32>
      %56 = vector.broadcast %55 : vector<3x1xf32> to vector<3x256xf32>
      %57 = arith.subf %4, %56 : vector<3x256xf32>
      %58 = arith.mulf %57, %57 : vector<3x256xf32>
      %cst_19 = arith.constant dense<0.000000e+00> : vector<256xf32>
      %59 = vector.multi_reduction <add>, %58, %cst_19 [0] : vector<3x256xf32> to vector<256xf32>
      %60 = vector.shape_cast %59 : vector<256xf32> to vector<1x256xf32>
      %61 = vector.broadcast %arg5 : i32 to vector<1x128xi32>
      %62 = arith.cmpi eq, %6, %61 : vector<1x128xi32>
      %c0_20 = arith.constant 0 : index
      %c0_21 = arith.constant 0 : index
      %c0_22 = arith.constant 0 : index
      %63 = vector.load %arg3[%c0_20, %c0_21, %c0_22] : memref<1x4x128xf32, #tpu.memory_space<vmem>>, vector<1x4x128xf32>
      %64 = vector.shape_cast %63 : vector<1x4x128xf32> to vector<4x128xf32>
      %65 = vector.shape_cast %62 : vector<1x128xi1> to vector<1x128xi1>
      %66 = vector.broadcast %65 : vector<1x128xi1> to vector<4x128xi1>
      %67 = vector.shape_cast %54 : vector<4x1xf32> to vector<4x1xf32>
      %68 = vector.broadcast %67 : vector<4x1xf32> to vector<4x128xf32>
      %69 = arith.select %66, %68, %64 : vector<4x128xi1>, vector<4x128xf32>
      %c0_23 = arith.constant 0 : index
      %c0_24 = arith.constant 0 : index
      %c0_25 = arith.constant 0 : index
      %70 = vector.load %arg3[%c0_23, %c0_24, %c0_25] : memref<1x4x128xf32, #tpu.memory_space<vmem>>, vector<1x4x128xf32>
      %71 = vector.shape_cast %70 : vector<1x4x128xf32> to vector<4x128xf32>
      %72 = vector.shape_cast %69 : vector<4x128xf32> to vector<1x4x128xf32>
      tpu.vector_store %arg3[%c0_23, %c0_24, %c0_25], %72 {strides = array<i32>} : memref<1x4x128xf32, #tpu.memory_space<vmem>>, vector<1x4x128xf32>,
      %c200_i32_26 = arith.constant 200 : i32
      %73 = vector.broadcast %c200_i32_26 : i32 to vector<1x256xi32>
      %74 = arith.cmpi slt, %5, %73 : vector<1x256xi32>
      %cst_27 = arith.constant -1.000000e+00 : f32
      %75 = vector.broadcast %cst_27 : f32 to vector<1x256xf32>
      %76 = arith.select %74, %60, %75 : vector<1x256xi1>, vector<1x256xf32>
      %77 = arith.minimumf %38, %76 : vector<1x256xf32>
      %c0_28 = arith.constant 0 : index
      %c0_29 = arith.constant 0 : index
      %78 = vector.load %arg4[%c0_28, %c0_29] : memref<1x256xf32, #tpu.memory_space<vmem>>, vector<1x256xf32>
      tpu.vector_store %arg4[%c0_28, %c0_29], %77 {strides = array<i32>} : memref<1x256xf32, #tpu.memory_space<vmem>>, vector<1x256xf32>,
    }
    %c63_i32_12 = arith.constant 63 : i32
    return
  }
  func.func @transform_0(%arg0: i32, %arg1: memref<2xi32, #tpu.memory_space<smem>>) -> (i32, i32, i32) {
    %c0_i32 = arith.constant 0 : i32
    %c0_i32_0 = arith.constant 0 : i32
    %c0_i32_1 = arith.constant 0 : i32
    return %arg0, %c0_i32, %c0_i32_0 : i32, i32, i32
  }
  func.func @transform_1(%arg0: i32, %arg1: memref<2xi32, #tpu.memory_space<smem>>) -> (i32, i32, i32) {
    %c0_i32 = arith.constant 0 : i32
    %c0_i32_0 = arith.constant 0 : i32
    %c0_i32_1 = arith.constant 0 : i32
    return %arg0, %c0_i32, %c0_i32_0 : i32, i32, i32
  }
}

</mosaic_0001>

<bundles_post_ra>
// kernel: tpu_custom_call.1
= control target key start
LH: loop header
LB: loop body
LE: loop exit
PB: predicated region body
PF: predicated region fallthrough
CT: control target
= control target key end

     0   :  { %s609_s12 = smov [#allocation4]   ;;  %s834_s0 = inlined_call_operand.hbm [shape: s32[2], index: 0, kind: input, shape index: {}]   ;;  %s835_s1 = inlined_call_operand.hbm [shape: f32[2,4,256], index: 1, kind: input, shape index: {}]   ;;  %s836_s2 = inlined_call_operand.hbm [shape: f32[2,4,128], index: 2, kind: output, shape index: {}]  }
   0x1   :  { %s8_s11 = sshll.u32 %s834_s0, 4  ;;  %s9_s11 = int_to_ptr.hbm [resolvable:$true] %s8_s11 }
   0x2   :  { %11 = dma.hbm_to_smem %s9_s11, 16, %s609_s12, [#allocation3] }
   0x3   :  { %579 = dma.done.wait [#allocation3], 16 }
   0x4   :  { %580 = vsyncadd [#allocation3], 4294967280 }
   0x5   :  { %14 = sfence }
   0x6   :  { %15 = vsyncpa [#allocation6], 0 }
   0x7   :  { %17 = vsyncpa [#allocation6 + $0x1], 0 }
   0x8   :  { %18 = vsyncpa [#allocation7], 0 }
   0x9   :  { %20 = vsyncpa [#allocation7 + $0x1], 0  ;;  %s630_s13 = smov 0   ;;  %s632_s14 = smov 0  }
   0xa   :  { %s634_s15 = smov 0   ;;  %s636_s16 = smov 0  }
   0xb LB: > { %s651_s0 = sadd.s32 4294967295, %s603_s16   ;;  %s418_s17 = sadd.s32 4294967294, %s603_s16   ;;  %s603_s16 = sphi %s636_s16, %s848_s16   ;;  %s599_s15 = sphi %s634_s15, %s847_s15   ;;  %s595_s14 = sphi %s632_s14, %s846_s14   ;;  %s591_s13 = sphi %s630_s13, %s845_s13  }
   0xc   : > { %s655_s18 = sadd.s32 1, %s603_s16   ;;  %s33_s19 = sadd.s32 1, %s599_s15 }
   0xd   : > { %s30_s20 = ssub.s32 %s603_s16, %s655_s18  ;;  %p40_p0 = scmp.ne.s32.totalorder %s599_s15, %s595_s14 }
   0xe   : > { %p31_p1 = scmp.eq.s32.totalorder %s30_s20, 0  ;;  %p41_p2 = scmp.eq.s32.totalorder %s603_s16, 0 }
   0xf   : > { %p46_p3 = scmp.ne.s32.totalorder %s595_s14, %s591_s13  ;;  %p47_p4 = scmp.eq.s32.totalorder %s651_s0, 0 }
  0x10   : > { %s667_s21 = scalar_select %p31_p1, %s599_s15, %s33_s19  }
  0x11   : > { %p669_p5 = por %p41_p2, %p40_p0  ;;  %p673_p6 = por %p47_p4, %p46_p3 }
  0x12   : > { %p70_p7 = scmp.eq.s32.totalorder %s651_s0, 1  ;;  %p76_p8 = scmp.eq.s32.totalorder %s418_s17, 1 }
  0x13   : > { %p444_p10 = scmp.lt.s32.totalorder %s603_s16, 2  ;;  %s96_s26 = sand.u32 1, %s599_s15  }
  0x14   : > { %p680_p11 = por %p70_p7, %p40_p0  ;;  %p684_p12 = por %p76_p8, %p46_p3 }
  0x15   : > { %s431_s27 = sshll.u32 %s603_s16, 3  ;;  %s421_s28 = sshll.u32 %s96_s26, 3 }
  0x16   : > { %s105_s3 = scalar_lea.hbm %s835_s1, %s431_s27  ;;  %s100_s5 = scalar_lea.vmem [#allocation5], %s421_s28 }
  0x17   : > { %s107_s4 = sshll.u32 %s105_s3, 4  ;;  %s109_s6 = sshll.u32 %s100_s5, 4  ;;  %s108_s4 = int_to_ptr.hbm [resolvable:$true] %s107_s4  ;;  %s110_s6 = int_to_ptr.vmem [resolvable:$true] %s109_s6 }
  0x18   : > { %p695_p13 = pnand %p444_p10, %p669_p5  ;;  %p424_p0 = scmp.ge.s32.totalorder %s603_s16, 1 }
  0x19   : > { %p114_p1 = scmp.lt.s32.totalorder %s603_s16, 3  ;;  %s97_s8 = scalar_lea.sflag [#allocation6], %s96_s26 }
  0x1a   : > { %s501_s9 = sshra.s32 %s108_s4, 4  ;;  %p505_p3 = pneg %p695_p13  ;;  %s502_s9 = int_to_ptr.hbm [resolvable:$true] %s501_s9 }
  0x1b   : > { %s503_s10 = scalar_lea.hbm %s502_s9, 8  ;;  %s508_s17 = scalar_lea.hbm %s835_s1, 16 }
  0x1c   : > { %p504_p2 = scmp.ne.s32.totalorder %s502_s9, %s503_s10  ;;  %p509_p5 = scmp.lt.s32.totalorder %s502_s9, %s835_s1 }
  0x1d   : > { %p510_p8 = scmp.lt.s32.totalorder %s508_s17, %s503_s10 }
  0x1e   : > { %p506_p4 = pnand %p505_p3, %p504_p2 }
  0x1f   : > { %p511_p10 = por %p510_p8, %p509_p5 }
  0x20   : > { %p507_p7 = pneg %p506_p4 }
  0x22   : > { %p512_p9 = pnand %p511_p10, %p507_p7 }
  0x24   : > { %515 = shalt.err (!%p512_p9)
}
  0x25   : > { %439 = dma.hbm_to_vmem [thread:$0]  (!%p695_p13), %s108_s4, 128, %s110_s6, %s97_s8  }
  0x26   : > { %p115_p2 = pnand %p424_p0, %p114_p1 }
  0x27   : > { %s716_s22 = sand.u32 (!%p115_p2), 1, %s595_s14  }
  0x28   : > { %118 = sbr.rel (%p115_p2) target bundleno = 747 (0x2eb), region = 24  ;;  %s425_s26 = sshll.u32 (!%p115_p2), %s716_s22, 3 }
  0x29   : > { %s121_s27 = scalar_lea.sflag (!%p115_p2), [#allocation6], %s716_s22  ;;  %s124_s28 = scalar_lea.vmem (!%p115_p2), [#allocation5], %s425_s26 }
  0x2d   : > { %582 = dma.done.wait (%p673_p6), %s121_s27, 128  }
  0x2e   : > { %584 = vsyncadd (%p673_p6), %s121_s27, 4294967168  ;;  %v146_v0 = vlaneseq  ;;  %s144_s29 = sld [smem:[#allocation4 + %s651_s0]]  ;;  %v727_v2 = vld [vmem:[%s124_s28] sm:$0xff]  ;;  %vm164_vm2 = vcmask 1043456   ;;  %v610_v12 = vmov 839922192  }
  0x2f   : > { %157 = vst [vmem:[#allocation1] ss:$2 sm:$0xff] %v727_v2  ;;  %v737_v13 = vunpack.c.l.s4 %v610_v12  ;;  %s426_s23 = sshll.u32 %s716_s22, 2  ;;  %vm184_vm4 = vcmask 1042432   ;;  %vm211_vm6 = vcmask 1040384   ;;  %s760_s3 = smov 1  }
  0x30   : > { %v725_v1 = vand.u32 127, %v146_v0  ;;  %s744_s30 = scalar_lea.vmem [#allocation8], %s426_s23  ;;  %vm753_vm7 = vcmp.lt.s32.totalorder %v146_v0, 256 }
  0x31   : > { %v173_v14 = vunpack.c.0.s8 %v737_v13 }
  0x32   : > { %v731_v3 = vadd.s32 128, %v725_v1  ;;  %vm199_vm3 = vcmp.eq.s32.totalorder %v725_v1, 0 }
  0x34   : > { %v149_v4 = vstv %s144_s29  ;;  %vm205_vm5 = vcmp.lt.s32.totalorder %v731_v3, 200 }
  0x35   : > { %vm150_vm0 = vcmp.eq.s32.totalorder %v725_v1, %v149_v4  ;;  %vm151_vm1 = vcmp.eq.s32.totalorder %v731_v3, %v149_v4 }
  0x36   : > { %v158_v5 = vld.sshfl [vmem:[#allocation1] sm:$0xff pattern:$0x75316420]  ;;  %v159_v6 = vld.sshfl [vmem:[#allocation1 + $0x8] sm:$0xff pattern:$0x75316420] }
  0x37   : > { %v162_v7 = vsel %vm150_vm0, %v158_v5, 0.0  ;;  %v163_v8 = vsel %vm151_vm1, %v159_v6, 0.0 }
  0x38   : > { %v165_v9 = vsel %vm164_vm2, %v162_v7, 0.0  ;;  %v166_v10 = vsel %vm164_vm2, %v163_v8, 0.0 }
  0x39   : > { %v167_v11 = vadd.f32 %v166_v10, %v165_v9 }
  0x3b   : > { %168 = vadd.xlane.f32.xlu0 %v167_v11 }
  0xae   : > { %v169_v15 = vpop.xlane.xlu0 %168 }
  0xaf   : > { %v174_v16 = vperm.slane %v169_v15, %v173_v14  ;;  %v202_v17 = vsel %vm199_vm3, %v169_v15, 0.0 }
  0xb0   : > { %203 = vst [vmem:[%s744_s30] sm:$0xf] %v202_v17 }
  0xb1   : > { %v176_v18 = vsub.f32 %v727_v2, %v174_v16 }
  0xb3   : > { %v177_v19 = vmul.f32 %v176_v18, %v176_v18 }
  0xb5   : > { %179 = vst [vmem:[#allocation1] ss:$2 sm:$0xff] %v177_v19 }
  0xbc   : > { %v180_v20 = vld.sshfl [vmem:[#allocation1] sm:$0xff pattern:$0x75316420]  ;;  %v181_v21 = vld.sshfl [vmem:[#allocation1 + $0x8] sm:$0xff pattern:$0x75316420] }
  0xbd   : > { %v185_v22 = vsel %vm184_vm4, %v180_v20, 0.0  ;;  %v192_v23 = vsel %vm184_vm4, %v181_v21, 0.0 }
  0xbe   : > { %v186_v24 = vrot.slane %v185_v22, 4  ;;  %v193_v25 = vrot.slane %v192_v23, 4 }
  0xc0   : > { %v187_v26 = vadd.f32 %v186_v24, %v185_v22  ;;  %v194_v27 = vadd.f32 %v193_v25, %v192_v23 }
  0xc2   : > { %v188_v28 = vrot.slane %v187_v26, 2  ;;  %v195_v29 = vrot.slane %v194_v27, 2 }
  0xc4   : > { %v189_v30 = vadd.f32 %v188_v28, %v187_v26  ;;  %v196_v31 = vadd.f32 %v195_v29, %v194_v27 }
  0xc6   : > { %v197_v32 = vrot.slane %v196_v31, 1  ;;  %v190_v33 = vrot.slane %v189_v30, 1 }
  0xc8   : > { %v198_v34 = vadd.f32 %v197_v32, %v196_v31  ;;  %v191_v37 = vadd.f32 %v190_v33, %v189_v30 }
  0xca   : > { %v207_v35 = vsel %vm205_vm5, %v198_v34, -1.0 }
  0xcb   : > { %v210_v38 = vrot.slane %v207_v35, 7 }
  0xcd   : > { %v212_v39 = vsel %vm211_vm6, %v191_v37, %v210_v38 }
  0xce   : > { %218 = vst.msk [vmem:[#allocation2] sm:$0x3] %vm753_vm7, %v212_v39 }
  0xcf LB: >> { %271 = vst [vmem:[#allocation1] ss:$2 sm:$0xff] %v727_v2  ;;  %v240_v46 = vrot.slane %v731_v3, 7  ;;  %v611_v6 = vmov 0   ;;  %v311_v20 = vstv %s607_s3  ;;  %v313_v21 = vld [vmem:[%s744_s30] sm:$0xf]  ;;  %s607_s3 = sphi %s760_s3, %s224_s3  }
  0xd0   : >> { %vm312_vm15 = vcmp.eq.s32.totalorder %v725_v1, %v311_v20  ;;  %s224_s3 = sadd.s32 1, %s607_s3  }
  0xd1   : >> { %v241_v48 = vsel %vm211_vm6, %v725_v1, %v240_v46  ;;  %p221_p6 = scmp.ge.s32.totalorder %s224_s3, 64  }
  0xd2   : > { %s428_s4 = sshll.u32 (%p221_p6), %s651_s0, 2  ;;  %s340_s8 = sshll.u32 (%p221_p6), %s744_s30, 4  ;;  %s341_s8 = int_to_ptr.vmem [resolvable:$true] %s340_s8 }
  0xd3   : > { %s338_s7 = scalar_lea.hbm (%p221_p6), %s836_s2, %s428_s4  ;;  %s328_s10 = scalar_lea.sflag (%p221_p6), [#allocation7], %s716_s22 }
  0xd4   : > { %s342_s9 = sshll.u32 (%p221_p6), %s338_s7, 4  ;;  %s551_s0 = scalar_lea.hbm (%p221_p6), %s836_s2, 8  ;;  %s343_s9 = int_to_ptr.hbm [resolvable:$true] %s342_s9 }
  0xd5   : >> { %v765_v40 = vld [vmem:[#allocation2] sm:$0x3]  ;;  %s545_s11 = sshra.s32 (%p221_p6), %s343_s9, 4  ;;  %s546_s11 = int_to_ptr.hbm [resolvable:$true] %s545_s11 }
  0xd6   : >> { %v227_v41 = vperm.slane %v765_v40, 0  ;;  %v228_v42 = vperm.slane %v765_v40, 1  ;;  %v272_v9 = vld.sshfl [vmem:[#allocation1] sm:$0xff pattern:$0x75316420]  ;;  %s547_s12 = scalar_lea.hbm (%p221_p6), %s546_s11, 4  ;;  %p552_p1 = scmp.lt.s32.totalorder (%p221_p6), %s546_s11, %s836_s2 }
  0xd7   : >> { %v273_v12 = vld.sshfl [vmem:[#allocation1 + $0x8] sm:$0xff pattern:$0x75316420]  ;;  %p548_p9 = scmp.ne.s32.totalorder (%p221_p6), %s546_s11, %s547_s12  ;;  %p553_p3 = scmp.lt.s32.totalorder (%p221_p6), %s551_s0, %s547_s12 }
  0xd8   : >> { %v231_v43 = vsel %vm211_vm6, %v227_v41, -inf  ;;  %v232_v44 = vsel %vm211_vm6, %v228_v42, -inf }
  0xd9   : >> { %v233_v45 = vmax.f32 %v231_v43, %v232_v44  ;;  %p549_p13 = pnand (%p221_p6), %p548_p9, %p680_p11  ;;  %p554_p4 = por (%p221_p6), %p553_p3, %p552_p1 }
  0xdb   : >> { %234 = vmax.xlane.f32.xlu0 %v233_v45  ;;  %p550_p0 = pneg (%p221_p6), %p549_p13 }
  0xdd   : > { %p555_p7 = pnand (%p221_p6), %p554_p4, %p550_p0 }
 0x14e   : >> { %v235_v47 = vpop.xlane.xlu0 %234 }
 0x14f   : >> { %v237_v49 = vperm.slane %v235_v47, 0 }
 0x151   : >> { %vm239_vm8 = vcmp.eq.f32.partialorder %v765_v40, %v237_v49 }
 0x152   : >> { %v242_v50 = vsel %vm239_vm8, %v241_v48, 256 }
 0x153   : >> { %v243_v51 = vperm.slane %v242_v50, 0  ;;  %v244_v52 = vperm.slane %v242_v50, 1 }
 0x155   : >> { %v245_v53 = vsel %vm211_vm6, %v243_v51, 2147483647  ;;  %v246_v54 = vsel %vm211_vm6, %v244_v52, 2147483647 }
 0x156   : >> { %vm247_vm9 = vcmp.lt.s32.totalorder %v245_v53, %v246_v54 }
 0x157   : >> { %v248_v55 = vsel %vm247_vm9, %v245_v53, %v246_v54 }
 0x158   : >> { %v250_v56 = vshra.s32 %v248_v55, 16  ;;  %v249_v58 = vand.u32 65535, %v248_v55 }
 0x15a   : >> { %v252_v57 = vcvt.s32.f32 %v250_v56  ;;  %v251_v60 = vcvt.s32.f32 %v249_v58 }
 0x15c   : >> { %253 = vmin.xlane.f32.xlu0 %v252_v57 }
 0x1cf   : >> { %v254_v59 = vpop.xlane.xlu0 %253 }
 0x1d0   : >> { %vm255_vm10 = vcmp.eq.f32.partialorder %v252_v57, %v254_v59  ;;  %v260_v62 = vcvt.f32.s32 %v254_v59 }
 0x1d1   : >> { %v256_v61 = vsel %vm255_vm10, %v251_v60, inf }
 0x1d2   : >> { %257 = vmin.xlane.f32.xlu1 %v256_v61  ;;  %v261_v0 = vshll.u32 %v260_v62, 16 }
 0x245   : >> { %v258_v63 = vpop.xlane.xlu1 %257 }
 0x246   : >> { %v259_v4 = vcvt.f32.s32 %v258_v63 }
 0x248   : >> { %v262_v5 = vadd.s32 %v261_v0, %v259_v4 }
 0x24a   : >> { %vm263_vm11 = vcmp.eq.s32.totalorder %v725_v1, %v262_v5  ;;  %vm264_vm12 = vcmp.eq.s32.totalorder %v731_v3, %v262_v5 }
 0x24b   : >> { %v265_v7 = vsel %vm263_vm11, 1, %v611_v6  ;;  %v266_v8 = vsel %vm264_vm12, 1, %v611_v6 }
 0x24c   : >> { %v267_v10 = vperm.slane %v265_v7, 0  ;;  %v268_v11 = vperm.slane %v266_v8, 0 }
 0x24e   : >> { %vm269_vm13 = vcmp.eq.s32.totalorder %v267_v10, 1  ;;  %vm270_vm14 = vcmp.eq.s32.totalorder %v268_v11, 1 }
 0x24f   : >> { %v276_v15 = vsel %vm269_vm13, %v272_v9, 0.0  ;;  %v277_v16 = vsel %vm270_vm14, %v273_v12, 0.0 }
 0x250   : >> { %v278_v17 = vsel %vm164_vm2, %v276_v15, 0.0  ;;  %v279_v18 = vsel %vm164_vm2, %v277_v16, 0.0 }
 0x251   : >> { %v280_v19 = vadd.f32 %v279_v18, %v278_v17 }
 0x253   : >> { %281 = vadd.xlane.f32.xlu1 %v280_v19 }
 0x2c6   : >> { %v282_v22 = vpop.xlane.xlu1 %281 }
 0x2c7   : >> { %v287_v23 = vperm.slane %v282_v22, %v173_v14  ;;  %v316_v24 = vsel %vm312_vm15, %v282_v22, %v313_v21 }
 0x2c8   : >> { %317 = vst [vmem:[%s744_s30] sm:$0xf] %v316_v24 }
 0x2c9   : >> { %v289_v25 = vsub.f32 %v727_v2, %v287_v23 }
 0x2cb   : >> { %v290_v26 = vmul.f32 %v289_v25, %v289_v25 }
 0x2cd   : >> { %292 = vst [vmem:[#allocation1] ss:$2 sm:$0xff] %v290_v26 }
 0x2d4   : >> { %v293_v27 = vld.sshfl [vmem:[#allocation1] sm:$0xff pattern:$0x75316420]  ;;  %v294_v28 = vld.sshfl [vmem:[#allocation1 + $0x8] sm:$0xff pattern:$0x75316420] }
 0x2d5   : >> { %v297_v29 = vsel %vm184_vm4, %v293_v27, 0.0  ;;  %v304_v30 = vsel %vm184_vm4, %v294_v28, 0.0 }
 0x2d6   : >> { %v298_v31 = vrot.slane %v297_v29, 4  ;;  %v305_v32 = vrot.slane %v304_v30, 4 }
 0x2d8   : >> { %v299_v33 = vadd.f32 %v298_v31, %v297_v29  ;;  %v306_v34 = vadd.f32 %v305_v32, %v304_v30 }
 0x2da   : >> { %v300_v35 = vrot.slane %v299_v33, 2  ;;  %v307_v37 = vrot.slane %v306_v34, 2 }
 0x2dc   : >> { %v301_v38 = vadd.f32 %v300_v35, %v299_v33  ;;  %v308_v39 = vadd.f32 %v307_v37, %v306_v34 }
 0x2de   : >> { %v309_v41 = vrot.slane %v308_v39, 1  ;;  %v302_v42 = vrot.slane %v301_v38, 1 }
 0x2e0   : >> { %v310_v43 = vadd.f32 %v309_v41, %v308_v39  ;;  %v303_v45 = vadd.f32 %v302_v42, %v301_v38 }
 0x2e2   : >> { %v319_v44 = vsel %vm205_vm5, %v310_v43, -1.0 }
 0x2e3   : >> { %v322_v46 = vrot.slane %v319_v44, 7 }
 0x2e4   : > { %223 = sbr.rel (!%p221_p6) target bundleno = 207 (0xcf), region = 76 }
 0x2e5   : >> { %v323_v47 = vsel %vm211_vm6, %v303_v45, %v322_v46 }
 0x2e6   : >> { %v325_v48 = vmin.f32 %v765_v40, %v323_v47 }
 0x2e8   : >> { %326 = vst.msk [vmem:[#allocation2] sm:$0x3] %vm753_vm7, %v325_v48 }
 0x2e9   : > { %558 = shalt.err (!%p555_p7)
}
 0x2ea   : > { %434 = dma.vmem_to_hbm [thread:$0]  (%p680_p11), %s341_s8, 64, %s343_s9, %s328_s10  }
 0x2eb PF: > { %s354_s22 = sand.u32 1, %s591_s13   ;;  %p844_p5 = scmp.ge.s32.totalorder %s603_s16, 2 }
 0x2ec   : > { %s355_s27 = scalar_lea.sflag [#allocation7], %s354_s22 }
 0x2ed   : > { %p441_p8 = pnand %p844_p5, %p684_p12 }
 0x2ef   : > { %p442_p10 = pneg %p441_p8 }
 0x2f1   : > { %586 = dma.done.wait (%p442_p10), %s355_s27, 64  }
 0x2f2   : > { %588 = vsyncadd (%p442_p10), %s355_s27, 4294967232  ;;  %p23_p2 = scmp.ge.s32.totalorder %s655_s18, 4   ;;  %s845_s13 = smov %s595_s14 }
 0x2f3   : > { %s846_s14 = smov %s599_s15  ;;  %s847_s15 = smov %s667_s21 }
 0x2f4   : > { %s848_s16 = smov %s655_s18  ;;  %25 = sbr.rel (!%p23_p2) target bundleno = 11 (0xb), region = 87 }
 0x2f9   :  { %361 = vsyncpa [#allocation6], 1 }
 0x2fa   :  { %363 = vsyncpa [#allocation6 + $0x1], 1 }
 0x2fb   :  { %364 = vsyncpa [#allocation7], 1 }
 0x2fc   :  { %366 = vsyncpa [#allocation7 + $0x1], 1 }

</bundles_post_ra>
